<compile_context>
chip_gen: v7x
topology: tpu7x:2x2x1
jax: 0.10.0
libtpu: 0.0.40
codegen_flags: <defaults>
</compile_context>

<pallas_src>
import functools
import math

import jax
import jax.numpy as jnp
from jax.experimental import pallas as pl
from jax.experimental.pallas import tpu as pltpu


_VMEM = pl.BlockSpec(memory_space=pltpu.MemorySpace.VMEM)

# Scoped-VMEM budget: above the 16 MiB v5e / 32 MiB v6e-v7x defaults, below
# v7x's 64 MiB physical per TensorCore.
_VMEM_LIMIT = 48 * 1024 * 1024


def _pick_tile(n, target):
    """Largest multiple-of-8 divisor of n that is <= target, else n (full dim).

    Keeps the (8, 128) sublane constraint satisfied for tiled BlockSpecs while
    degrading gracefully to whole-array blocks at toy shapes.
    """
    if n <= target:
        return n
    best = None
    t = 8
    while t <= target:
        if n % t == 0:
            best = t
        t += 8
    return best if best is not None else n


def _ln(x, gamma, beta, eps):
    """LayerNorm over the last axis (f32 statistics); gamma/beta are (1, H)."""
    mu = jnp.mean(x, axis=-1, keepdims=True)
    var = jnp.mean(jnp.square(x - mu), axis=-1, keepdims=True)
    return (x - mu) * jax.lax.rsqrt(var + eps) * gamma + beta


# --------------------------------------------------------------------------
# Fused embeddings: (inputs_embeds + position + token_type) -> LayerNorm
# Grid over sequence tiles ("parallel").
# --------------------------------------------------------------------------

def _embed_ln_kernel(emb_ref, pe_ref, g_ref, b_ref, o_ref, *, eps):
    B, T, H = emb_ref.shape
    x = emb_ref[...] + pe_ref[...][None, :, :]          # (B,T,H) + (1,T,H)
    y = _ln(x.reshape(B * T, H), g_ref[...], b_ref[...], eps)
    o_ref[...] = y.reshape(B, T, H)


def embed_ln(emb, pe, gamma, beta, eps=1e-12, seq_tile=256):
    B, S, H = emb.shape
    ts = _pick_tile(S, seq_tile)
    grid = (S // ts,)
    return pl.pallas_call(
        functools.partial(_embed_ln_kernel, eps=eps),
        out_shape=jax.ShapeDtypeStruct((B, S, H), jnp.float32),
        grid_spec=pltpu.PrefetchScalarGridSpec(
            num_scalar_prefetch=0,
            grid=grid,
            in_specs=[pl.BlockSpec((B, ts, H), lambda i: (0, i, 0)),
                      pl.BlockSpec((ts, H), lambda i: (i, 0)),
                      pl.BlockSpec((1, H), lambda i: (0, 0)),
                      pl.BlockSpec((1, H), lambda i: (0, 0))],
            out_specs=pl.BlockSpec((B, ts, H), lambda i: (0, i, 0))),
        compiler_params=pltpu.CompilerParams(
            dimension_semantics=("parallel",)),
    )(emb, pe, gamma, beta)


# --------------------------------------------------------------------------
# Fused BERT encoder: ONE pallas_call, grid = (num_layers,).
#   Layer weights are stacked on a leading L dim and streamed per grid step
#   (BlockSpec prefetches layer l+1 while layer l computes). The hidden state
#   is carried in the resident output block (init from h0 at l == 0).
#   Per layer: fused QKV matmul -> MHA (per-head, accumulate into out-proj)
#   -> residual + LN -> FFN(GELU) -> residual + LN.
# --------------------------------------------------------------------------

def _encoder_kernel(madd_ref, h0_ref, wqkv_ref, bqkv_ref, wo_ref, bo_ref,
                    ln1g_ref, ln1b_ref, wi_ref, bi_ref, wo2_ref, bo2_ref,
                    ln2g_ref, ln2b_ref, o_ref, *, num_heads, eps):
    layer = pl.program_id(0)

    # Seed the carried hidden state from the embedding output on layer 0.
    @pl.when(layer == 0)
    def _():
        o_ref[...] = h0_ref[...]

    B, S, H = o_ref.shape
    nh = num_heads
    dh = H // nh

    x = o_ref[...]                                       # (B,S,H) f32 carry
    x2 = x.reshape(B * S, H)
    xb = x2.astype(jnp.bfloat16)

    # Fused Q|K|V projection: one bf16 MXU pass, f32 accumulation.
    # (The 1/sqrt(dh) scale is pre-folded into the Q columns of wqkv/bqkv.)
    qkv = (jnp.dot(xb, wqkv_ref[...], preferred_element_type=jnp.float32)
           + bqkv_ref[...])                              # (B*S, 3H) f32

    # Additive key mask, broadcast hoisted out of the per-head loop.
    madd_b = madd_ref[...][:, None, :]                   # (B, 1, S)

    # Multi-head attention: accumulate each head's context straight into the
    # output projection (no concat, bounded live ranges).
    attn_acc = jnp.zeros((B * S, H), jnp.float32)
    for hh in range(nh):
        q_h = qkv[:, hh * dh:(hh + 1) * dh].reshape(B, S, dh)
        k_h = qkv[:, H + hh * dh:H + (hh + 1) * dh].reshape(B, S, dh)
        v_h = qkv[:, 2 * H + hh * dh:2 * H + (hh + 1) * dh].reshape(B, S, dh)
        q_h = q_h.astype(jnp.bfloat16)
        k_h = k_h.astype(jnp.bfloat16)
        v_h = v_h.astype(jnp.bfloat16)

        s = jnp.einsum("bqd,bkd->bqk", q_h, k_h,
                       preferred_element_type=jnp.float32)
        s = s + madd_b                                   # (B,S,S) f32
        m = jnp.max(s, axis=-1, keepdims=True)
        p = jnp.exp(s - m)
        denom = jnp.sum(p, axis=-1, keepdims=True)
        p = p * pl.reciprocal(denom, approx=True)        # EUP, not VALU divide

        ctx = jnp.einsum("bqk,bkd->bqd", p.astype(jnp.bfloat16), v_h,
                         preferred_element_type=jnp.float32)     # (B,S,dh)
        attn_acc = attn_acc + jnp.dot(
            ctx.reshape(B * S, dh).astype(jnp.bfloat16),
            wo_ref[hh * dh:(hh + 1) * dh, :],
            preferred_element_type=jnp.float32)

    attn = attn_acc + bo_ref[...]
    x1 = _ln(attn + x2, ln1g_ref[...], ln1b_ref[...], eps)

    # FFN (exact erf GELU, as in BERT) + residual + LayerNorm.
    ffn = (jnp.dot(x1.astype(jnp.bfloat16), wi_ref[...],
                   preferred_element_type=jnp.float32) + bi_ref[...])
    ffn = jax.nn.gelu(ffn, approximate=False)
    out = (jnp.dot(ffn.astype(jnp.bfloat16), wo2_ref[...],
                   preferred_element_type=jnp.float32) + bo2_ref[...])
    h_new = _ln(out + x1, ln2g_ref[...], ln2b_ref[...], eps)

    o_ref[...] = h_new.reshape(B, S, H)


def bert_encoder(h0, madd, ep, num_heads, eps=1e-12):
    B, S, H = h0.shape
    L = ep["wqkv"].shape[0]
    I = ep["wi"].shape[-1]

    def res_spec(shape):                       # resident across the layer axis
        nd = len(shape)
        return pl.BlockSpec(shape, lambda l, _nd=nd: (0,) * _nd)

    def w_spec(*shape):                        # one layer slice per grid step
        nd = len(shape)
        return pl.BlockSpec((None,) + shape,
                            lambda l, _nd=nd: (l,) + (0,) * _nd)

    grid_spec = pltpu.PrefetchScalarGridSpec(
        num_scalar_prefetch=0,
        grid=(L,),
        in_specs=[
            res_spec((B, S)),                  # additive mask
            res_spec((B, S, H)),               # h0 (embedding output)
            w_spec(H, 3 * H),                  # wqkv (bf16)
            w_spec(1, 3 * H),                  # bqkv
            w_spec(H, H),                      # wo   (bf16)
            w_spec(1, H),                      # bo
            w_spec(1, H),                      # ln1_g
            w_spec(1, H),                      # ln1_b
            w_spec(H, I),                      # wi   (bf16)
            w_spec(1, I),                      # bi
            w_spec(I, H),                      # wo2  (bf16)
            w_spec(1, H),                      # bo2
            w_spec(1, H),                      # ln2_g
            w_spec(1, H),                      # ln2_b
        ],
        out_specs=pl.BlockSpec((B, S, H), lambda l: (0, 0, 0)),
    )

    return pl.pallas_call(
        functools.partial(_encoder_kernel, num_heads=num_heads, eps=eps),
        out_shape=jax.ShapeDtypeStruct((B, S, H), jnp.float32),
        grid_spec=grid_spec,
        compiler_params=pltpu.CompilerParams(
            dimension_semantics=("arbitrary",),     # layer carry is sequential
            vmem_limit_bytes=_VMEM_LIMIT),
    )(madd, h0, ep["wqkv"], ep["bqkv"], ep["wo"], ep["bo"],
      ep["ln1_g"], ep["ln1_b"], ep["wi"], ep["bi"], ep["wo2"], ep["bo2"],
      ep["ln2_g"], ep["ln2_b"])


# --------------------------------------------------------------------------
# Fused projection head: Linear(no bias, bf16 weight) + Dropout(id)
#   + LayerNorm(eps=1e-6).  Grid over row tiles ("parallel").
# --------------------------------------------------------------------------

def _proj_ln_kernel(x_ref, w_ref, g_ref, b_ref, o_ref, *, eps):
    y = jnp.dot(x_ref[...].astype(w_ref.dtype), w_ref[...],
                preferred_element_type=jnp.float32)
    o_ref[...] = _ln(y, g_ref[...], b_ref[...], eps)


def proj_ln(x2d, w, gamma, beta, eps, row_tile=512):
    M, K = x2d.shape
    N = w.shape[1]
    tm = _pick_tile(M, row_tile)
    return pl.pallas_call(
        functools.partial(_proj_ln_kernel, eps=eps),
        out_shape=jax.ShapeDtypeStruct((M, N), jnp.float32),
        grid_spec=pltpu.PrefetchScalarGridSpec(
            num_scalar_prefetch=0,
            grid=(M // tm,),
            in_specs=[pl.BlockSpec((tm, K), lambda i: (i, 0)),
                      pl.BlockSpec((K, N), lambda i: (0, 0)),
                      pl.BlockSpec((1, N), lambda i: (0, 0)),
                      pl.BlockSpec((1, N), lambda i: (0, 0))],
            out_specs=pl.BlockSpec((tm, N), lambda i: (i, 0))),
        compiler_params=pltpu.CompilerParams(
            dimension_semantics=("parallel",)),
    )(x2d, w, gamma, beta)


# --------------------------------------------------------------------------
# Fused head: mean-pool over seq + classifier + CrossEntropy / accuracy /
# argmax (unmasked mean over the full sequence, matching torch.mean(h, dim=1))
# --------------------------------------------------------------------------

def _head_kernel(h_ref, w_ref, b_ref, lab_ref, loss_ref, acc_ref, pred_ref,
                 *, inv_len):
    pooled = jnp.sum(h_ref[...], axis=1) * inv_len                  # (B, H)
    logits = (jnp.dot(pooled, w_ref[...], preferred_element_type=jnp.float32)
              + b_ref[...])                                         # (B, C)
    bsz, c = logits.shape
    labels = lab_ref[...]                                           # (B, 1) i32

    mx = jnp.max(logits, axis=1, keepdims=True)
    z = logits - mx
    lse = jnp.log(jnp.sum(jnp.exp(z), axis=1, keepdims=True))
    logp = z - lse                                                  # log-softmax
    ids = jax.lax.broadcasted_iota(jnp.int32, (bsz, c), 1)
    onehot = (ids == labels).astype(jnp.float32)
    nll = -jnp.sum(onehot * logp, axis=1, keepdims=True)            # (B, 1)
    loss_ref[...] = jnp.sum(nll, axis=0, keepdims=True) * (1.0 / bsz)

    # argmax (first occurrence of the max, like torch.argmax)
    pred = jnp.min(jnp.where(logits == mx, ids, c), axis=1, keepdims=True)
    pred_ref[...] = pred
    acc_ref[...] = (jnp.sum((pred == labels).astype(jnp.float32),
                            axis=0, keepdims=True) * (1.0 / bsz))


def head(h, w, b, labels_1d):
    bsz, seq, _ = h.shape
    return pl.pallas_call(
        functools.partial(_head_kernel, inv_len=1.0 / seq),
        out_shape=(jax.ShapeDtypeStruct((1, 1), jnp.float32),       # loss
                   jax.ShapeDtypeStruct((1, 1), jnp.float32),       # accuracy
                   jax.ShapeDtypeStruct((bsz, 1), jnp.int32)),      # pred ids
        in_specs=[_VMEM] * 4,
        out_specs=(_VMEM, _VMEM, _VMEM),
    )(h, w, b, labels_1d.reshape(bsz, 1).astype(jnp.int32))


# --------------------------------------------------------------------------
# DualBertMultiModal forward
# --------------------------------------------------------------------------

def forward(params, inputs):
    cfg = params["cfg"]
    d = cfg["fusion_hidden"]

    # Additive key masks are computed ONCE here and kept resident in the
    # encoder (not recomputed per layer).
    text_madd = (1.0 - inputs["text_mask"].astype(jnp.float32)) * -10000.0
    frame_madd = (1.0 - inputs["frame_mask"].astype(jnp.float32)) * -10000.0

    # ---- text_bert(input_ids, attention_mask).last_hidden_state ----
    tb = params["text_bert"]
    we = jnp.take(tb["word_emb"], inputs["text_input"], axis=0)     # (B, LT, H)
    lt = we.shape[1]
    pe_t = tb["pos_emb"][:lt] + tb["type_emb"][0][None, :]          # token_type 0
    text_h = embed_ln(we, pe_t, tb["ln_g"], tb["ln_b"])
    text_h = bert_encoder(text_h, text_madd, tb["enc"], cfg["text_heads"])

    # ---- text_proj: Linear(no bias) -> Dropout(id) -> LayerNorm(eps=1e-6) ----
    bsz, lt, ht = text_h.shape
    t2 = proj_ln(text_h.reshape(bsz * lt, ht), params["text_proj_w"],
                 params["text_proj_ln_g"], params["text_proj_ln_b"], 1e-6)
    text_emb = t2.reshape(bsz, lt, d)

    # ---- video_proj on frame_input ----
    frame = inputs["frame_input"]
    _, lv, fdim = frame.shape
    v2 = proj_ln(frame.reshape(bsz * lv, fdim), params["video_proj_w"],
                 params["video_proj_ln_g"], params["video_proj_ln_b"], 1e-6)
    video_emb = v2.reshape(bsz, lv, d)

    # ---- fusion BERT (inputs_embeds, token_type_ids = all ones) ----
    fb = params["fusion_bert"]
    fusion_emb = jnp.concatenate([text_emb, video_emb], axis=1)
    fusion_madd = jnp.concatenate([text_madd, frame_madd], axis=1)
    sf = fusion_emb.shape[1]
    pe_f = fb["pos_emb"][:sf] + fb["type_emb"][1][None, :]          # token_type 1
    fh = embed_ln(fusion_emb, pe_f, fb["ln_g"], fb["ln_b"])
    fh = bert_encoder(fh, fusion_madd, fb["enc"], cfg["fusion_heads"])

    # ---- mean over seq + classifier + cal_loss (one fused kernel) ----
    label = inputs["label"][:, 0]                                   # squeeze(dim=1)
    loss, acc, pred = head(fh, params["cls_w"], params["cls_b"], label)
    return loss[0, 0], acc[0, 0], pred[:, 0], label


# --------------------------------------------------------------------------
# Deterministic parameter construction (synthetic, no checkpoint load).
# Encoder weights are built STACKED on a leading layer dim (kernel-ready),
# with the 1/sqrt(dh) attention scale folded into Q, and cast to bf16.
# --------------------------------------------------------------------------

def make_bert_params(key, vocab, max_pos, type_vocab, hidden, layers, inter,
                     num_heads):
    ks = jax.random.split(key, 7)

    def nrm(k, shape):
        return 0.02 * jax.random.normal(k, shape, jnp.float32)

    dh = hidden // num_heads
    scale = 1.0 / math.sqrt(dh)

    wqkv = nrm(ks[3], (layers, hidden, 3 * hidden))
    bqkv = jnp.zeros((layers, 1, 3 * hidden), jnp.float32)
    # Fold the attention scale into the Q columns (weight AND bias).
    wqkv = wqkv.at[:, :, :hidden].multiply(scale)
    bqkv = bqkv.at[:, :, :hidden].multiply(scale)

    return {
        "word_emb": nrm(ks[0], (vocab, hidden)),
        "pos_emb": nrm(ks[1], (max_pos, hidden)),
        "type_emb": nrm(ks[2], (type_vocab, hidden)),
        "ln_g": jnp.ones((1, hidden), jnp.float32),
        "ln_b": jnp.zeros((1, hidden), jnp.float32),
        "enc": {
            "wqkv": wqkv.astype(jnp.bfloat16),
            "bqkv": bqkv,
            "wo": nrm(ks[4], (layers, hidden, hidden)).astype(jnp.bfloat16),
            "bo": jnp.zeros((layers, 1, hidden), jnp.float32),
            "ln1_g": jnp.ones((layers, 1, hidden), jnp.float32),
            "ln1_b": jnp.zeros((layers, 1, hidden), jnp.float32),
            "wi": nrm(ks[5], (layers, hidden, inter)).astype(jnp.bfloat16),
            "bi": jnp.zeros((layers, 1, inter), jnp.float32),
            "wo2": nrm(ks[6], (layers, inter, hidden)).astype(jnp.bfloat16),
            "bo2": jnp.zeros((layers, 1, hidden), jnp.float32),
            "ln2_g": jnp.ones((layers, 1, hidden), jnp.float32),
            "ln2_b": jnp.zeros((layers, 1, hidden), jnp.float32),
        },
    }


if __name__ == "__main__":
    key = jax.random.PRNGKey(0)
    B, LT, LV = 2, 8, 4
    TEXT_HIDDEN, TEXT_HEADS, TEXT_LAYERS = 32, 2, 2
    FRAME_DIM = 48                                   # args.frame_embedding_size
    FUSION_HIDDEN, FUSION_HEADS, FUSION_LAYERS = 32, 2, 1
    VOCAB, NUM_CLASSES = 30, 10                      # synthetic CATEGORY_ID_LIST

    (k_text, k_fusion, k_p1, k_p2, k_cls,
     k_in1, k_in2, k_lab) = jax.random.split(key, 8)

    params = {
        "cfg": {"text_heads": TEXT_HEADS, "fusion_heads": FUSION_HEADS,
                "fusion_hidden": FUSION_HIDDEN},
        "text_bert": make_bert_params(k_text, VOCAB, 64, 2, TEXT_HIDDEN,
                                      TEXT_LAYERS, 4 * TEXT_HIDDEN,
                                      TEXT_HEADS),
        "fusion_bert": make_bert_params(k_fusion, 1, 64, 2, FUSION_HIDDEN,
                                        FUSION_LAYERS, 4 * FUSION_HIDDEN,
                                        FUSION_HEADS),
        "text_proj_w": (0.02 * jax.random.normal(
            k_p1, (TEXT_HIDDEN, FUSION_HIDDEN))).astype(jnp.bfloat16),
        "text_proj_ln_g": jnp.ones((1, FUSION_HIDDEN), jnp.float32),
        "text_proj_ln_b": jnp.zeros((1, FUSION_HIDDEN), jnp.float32),
        "video_proj_w": (0.02 * jax.random.normal(
            k_p2, (FRAME_DIM, FUSION_HIDDEN))).astype(jnp.bfloat16),
        "video_proj_ln_g": jnp.ones((1, FUSION_HIDDEN), jnp.float32),
        "video_proj_ln_b": jnp.zeros((1, FUSION_HIDDEN), jnp.float32),
        "cls_w": 0.02 * jax.random.normal(k_cls, (FUSION_HIDDEN, NUM_CLASSES)),
        "cls_b": jnp.zeros((1, NUM_CLASSES), jnp.float32),
    }

    inputs = {
        "text_input": jax.random.randint(k_in1, (B, LT), 0, VOCAB, jnp.int32),
        "text_mask": jnp.array([[1] * LT, [1] * (LT - 2) + [0, 0]], jnp.int32),
        "frame_input": jax.random.normal(k_in2, (B, LV, FRAME_DIM), jnp.float32),
        "frame_mask": jnp.array([[1, 1, 1, 1], [1, 1, 1, 0]], jnp.int32),
        "label": jax.random.randint(k_lab, (B, 1), 0, NUM_CLASSES, jnp.int32),
    }

    loss, acc, pred, label = forward(params, inputs)
    jax.block_until_ready((loss, acc, pred, label))
    print("KERNEL_OK")
</pallas_src>

<mosaic_0001>
module attributes {stable_mosaic.version = 11 : i64} {
  func.func @_embed_ln_kernel(%arg0: i32, %arg1: memref<2x8x32xf32, #tpu.memory_space<vmem>>, %arg2: memref<8x32xf32, #tpu.memory_space<vmem>>, %arg3: memref<1x32xf32, #tpu.memory_space<vmem>>, %arg4: memref<1x32xf32, #tpu.memory_space<vmem>>, %arg5: memref<2x8x32xf32, #tpu.memory_space<vmem>>) attributes {dimension_semantics = [#tpu.dimension_semantics<parallel>], iteration_bounds = array<i64: 1>, scalar_prefetch = 0 : i64, scratch_operands = 0 : i64, tpu.core_type = #tpu.core_type<tc>, window_params = [{transform_indices = @transform_0, window_bounds = array<i64: 2, 8, 32>}, {transform_indices = @transform_1, window_bounds = array<i64: 8, 32>}, {pipeline_mode = #tpu.pipeline_mode<synchronous>, transform_indices = @transform_2, window_bounds = array<i64: 1, 32>}, {pipeline_mode = #tpu.pipeline_mode<synchronous>, transform_indices = @transform_3, window_bounds = array<i64: 1, 32>}, {transform_indices = @transform_4, window_bounds = array<i64: 2, 8, 32>}]} {
    %c0 = arith.constant 0 : index
    %c0_0 = arith.constant 0 : index
    %c0_1 = arith.constant 0 : index
    %0 = vector.load %arg1[%c0, %c0_0, %c0_1] : memref<2x8x32xf32, #tpu.memory_space<vmem>>, vector<2x8x32xf32>
    %c0_2 = arith.constant 0 : index
    %c0_3 = arith.constant 0 : index
    %1 = vector.load %arg2[%c0_2, %c0_3] : memref<8x32xf32, #tpu.memory_space<vmem>>, vector<8x32xf32>
    %2 = vector.shape_cast %1 : vector<8x32xf32> to vector<1x8x32xf32>
    %3 = vector.broadcast %2 : vector<1x8x32xf32> to vector<2x8x32xf32>
    %4 = arith.addf %0, %3 : vector<2x8x32xf32>
    %5 = vector.shape_cast %4 : vector<2x8x32xf32> to vector<16x32xf32>
    %c0_4 = arith.constant 0 : index
    %c0_5 = arith.constant 0 : index
    %6 = vector.load %arg3[%c0_4, %c0_5] : memref<1x32xf32, #tpu.memory_space<vmem>>, vector<1x32xf32>
    %c0_6 = arith.constant 0 : index
    %c0_7 = arith.constant 0 : index
    %7 = vector.load %arg4[%c0_6, %c0_7] : memref<1x32xf32, #tpu.memory_space<vmem>>, vector<1x32xf32>
    %cst = arith.constant dense<0.000000e+00> : vector<16xf32>
    %8 = vector.multi_reduction <add>, %5, %cst [1] : vector<16x32xf32> to vector<16xf32>
    %9 = vector.shape_cast %8 : vector<16xf32> to vector<16x1xf32>
    %cst_8 = arith.constant 3.200000e+01 : f32
    %10 = vector.broadcast %cst_8 : f32 to vector<16x1xf32>
    %11 = arith.divf %9, %10 : vector<16x1xf32>
    %12 = vector.broadcast %11 : vector<16x1xf32> to vector<16x32xf32>
    %13 = arith.subf %5, %12 : vector<16x32xf32>
    %14 = arith.mulf %13, %13 : vector<16x32xf32>
    %cst_9 = arith.constant dense<0.000000e+00> : vector<16xf32>
    %15 = vector.multi_reduction <add>, %14, %cst_9 [1] : vector<16x32xf32> to vector<16xf32>
    %16 = vector.shape_cast %15 : vector<16xf32> to vector<16x1xf32>
    %cst_10 = arith.constant 3.200000e+01 : f32
    %17 = vector.broadcast %cst_10 : f32 to vector<16x1xf32>
    %18 = arith.divf %16, %17 : vector<16x1xf32>
    %19 = vector.broadcast %11 : vector<16x1xf32> to vector<16x32xf32>
    %20 = arith.subf %5, %19 : vector<16x32xf32>
    %cst_11 = arith.constant 9.99999996E-13 : f32
    %21 = vector.broadcast %cst_11 : f32 to vector<16x1xf32>
    %22 = arith.addf %18, %21 : vector<16x1xf32>
    %23 = math.rsqrt %22 : vector<16x1xf32>
    %24 = vector.broadcast %23 : vector<16x1xf32> to vector<16x32xf32>
    %25 = arith.mulf %20, %24 : vector<16x32xf32>
    %26 = vector.broadcast %6 : vector<1x32xf32> to vector<16x32xf32>
    %27 = arith.mulf %25, %26 : vector<16x32xf32>
    %28 = vector.broadcast %7 : vector<1x32xf32> to vector<16x32xf32>
    %29 = arith.addf %27, %28 : vector<16x32xf32>
    %30 = vector.shape_cast %29 : vector<16x32xf32> to vector<2x8x32xf32>
    %c0_12 = arith.constant 0 : index
    %c0_13 = arith.constant 0 : index
    %c0_14 = arith.constant 0 : index
    %31 = vector.load %arg5[%c0_12, %c0_13, %c0_14] : memref<2x8x32xf32, #tpu.memory_space<vmem>>, vector<2x8x32xf32>
    tpu.vector_store %arg5[%c0_12, %c0_13, %c0_14], %30 {strides = array<i32>} : memref<2x8x32xf32, #tpu.memory_space<vmem>>, vector<2x8x32xf32>,
    return
  }
  func.func @transform_0(%arg0: i32) -> (i32, i32, i32) {
    %c0_i32 = arith.constant 0 : i32
    %c0_i32_0 = arith.constant 0 : i32
    %c0_i32_1 = arith.constant 0 : i32
    return %c0_i32, %arg0, %c0_i32_0 : i32, i32, i32
  }
  func.func @transform_1(%arg0: i32) -> (i32, i32) {
    %c0_i32 = arith.constant 0 : i32
    %c0_i32_0 = arith.constant 0 : i32
    return %arg0, %c0_i32 : i32, i32
  }
  func.func @transform_2(%arg0: i32) -> (i32, i32) {
    %c0_i32 = arith.constant 0 : i32
    %c0_i32_0 = arith.constant 0 : i32
    %c0_i32_1 = arith.constant 0 : i32
    return %c0_i32, %c0_i32_0 : i32, i32
  }
  func.func @transform_3(%arg0: i32) -> (i32, i32) {
    %c0_i32 = arith.constant 0 : i32
    %c0_i32_0 = arith.constant 0 : i32
    %c0_i32_1 = arith.constant 0 : i32
    return %c0_i32, %c0_i32_0 : i32, i32
  }
  func.func @transform_4(%arg0: i32) -> (i32, i32, i32) {
    %c0_i32 = arith.constant 0 : i32
    %c0_i32_0 = arith.constant 0 : i32
    %c0_i32_1 = arith.constant 0 : i32
    return %c0_i32, %arg0, %c0_i32_0 : i32, i32, i32
  }
}

</mosaic_0001>

<bundles_post_ra>
// kernel: tpu_custom_call.1
= control target key start
LH: loop header
LB: loop body
LE: loop exit
PB: predicated region body
PF: predicated region fallthrough
CT: control target
= control target key end

     0   :  { %9 = vsyncpa [#allocation3], 0  ;;  %s282_s0 = inlined_call_operand.hbm [shape: f32[2,8,32], index: 0, kind: input, shape index: {}]   ;;  %s283_s1 = inlined_call_operand.hbm [shape: f32[8,32], index: 1, kind: input, shape index: {}]   ;;  %s284_s2 = inlined_call_operand.vmem [shape: f32[1,32], index: 2, kind: input, shape index: {}]   ;;  %s285_s3 = inlined_call_operand.vmem [shape: f32[1,32], index: 3, kind: input, shape index: {}]   ;;  %s286_s4 = inlined_call_operand.hbm [shape: f32[2,8,32], index: 4, kind: output, shape index: {}]  }
   0x1   :  { %10 = vsyncpa [#allocation6], 0 }
   0x2   :  { %11 = vsyncpa [#allocation4], 0  ;;  %s198_s15 = smov [#allocation2]   ;;  %s126_s19 = scalar_lea.hbm %s282_s0, 256 }
   0x3   :  { %s17_s16 = sshll.u32 %s198_s15, 4  ;;  %p127_p0 = scmp.ne.s32.totalorder %s282_s0, %s126_s19  ;;  %s18_s16 = int_to_ptr.vmem [resolvable:$true] %s17_s16 }
   0x4   :  { %p130_p1 = scmp.lt.u32.totalorder %s126_s19, %s282_s0 }
   0x6   :  { %p132_p2 = pnand %p130_p1, %p127_p0 }
   0x8   :  { %135 = shalt.err (!%p132_p2)
}
   0x9   :  { %s136_s24 = scalar_lea.vmem %s18_s16, 256  ;;  %p141_p4 = scmp.lt.s32.totalorder %s18_s16, %s18_s16 }
   0xa   :  { %p137_p3 = scmp.ne.s32.totalorder %s18_s16, %s136_s24  ;;  %p142_p5 = scmp.lt.s32.totalorder %s136_s24, %s136_s24 }
   0xc   :  { %p143_p6 = por %p142_p5, %p141_p4 }
   0xe   :  { %p144_p7 = pnand %p143_p6, %p137_p3 }
  0x10   :  { %147 = shalt.err (!%p144_p7)
}
  0x11   :  { %s199_s25 = smov 128   ;;  %s200_s26 = smov 8  }
  0x12   :  { %23 = dma.hbm_to_vmem [thread:$0]  %s282_s0, 256, %s18_s16, [#allocation3], %s199_s25, %s199_s25, %s200_s26  }
  0x13   :  { %s201_s29 = smov [#allocation5]   ;;  %s148_s7 = scalar_lea.hbm %s283_s1, 128 }
  0x14   :  { %s30_s30 = sshll.u32 %s201_s29, 4  ;;  %p149_p8 = scmp.ne.s32.totalorder %s283_s1, %s148_s7  ;;  %s31_s30 = int_to_ptr.vmem [resolvable:$true] %s30_s30 }
  0x15   :  { %p152_p9 = scmp.lt.u32.totalorder %s148_s7, %s283_s1 }
  0x17   :  { %p154_p10 = pnand %p152_p9, %p149_p8 }
  0x19   :  { %157 = shalt.err (!%p154_p10)
}
  0x1a   :  { %s158_s12 = scalar_lea.vmem %s31_s30, 128  ;;  %p163_p12 = scmp.lt.s32.totalorder %s31_s30, %s31_s30 }
  0x1b   :  { %p159_p11 = scmp.ne.s32.totalorder %s31_s30, %s158_s12  ;;  %p164_p13 = scmp.lt.s32.totalorder %s158_s12, %s158_s12 }
  0x1d   :  { %p165_p0 = por %p164_p13, %p163_p12 }
  0x1f   :  { %p166_p1 = pnand %p165_p0, %p159_p11 }
  0x21   :  { %169 = shalt.err (!%p166_p1)
}
  0x22   :  { %33 = dma.hbm_to_vmem [thread:$0]  %s283_s1, 128, %s31_s30, [#allocation6]  }
  0x23   :  { %192 = dma.done.wait [#allocation3], 256  }
  0x24   :  { %193 = vsyncadd [#allocation3], 4294967040 }
  0x25   :  { %194 = dma.done.wait [#allocation6], 128  }
  0x26   :  { %195 = vsyncadd [#allocation6], 4294967168  ;;  %v44_v0 = vld [vmem:[#allocation2] sm:$0xff]  ;;  %v46_v1 = vld [vmem:[#allocation5] sm:$0xff]  ;;  %vm51_vm0 = vcmask 261120   ;;  %s202_s17 = smov [#allocation7]  }
  0x27   :  { %v45_v2 = vld [vmem:[#allocation2 + $0x8] sm:$0xff]  ;;  %v47_v3 = vadd.f32 %v46_v1, %v44_v0  ;;  %v115_v24 = vld [vmem:[%s284_s2] ss:$0 sm:$0xff]  ;;  %s102_s18 = sshll.u32 %s202_s17, 4  ;;  %s103_s18 = int_to_ptr.vmem [resolvable:$true] %s102_s18 }
  0x28   :  { %v48_v4 = vadd.f32 %v46_v1, %v45_v2  ;;  %v116_v26 = vld [vmem:[%s285_s3] ss:$0 sm:$0xff]  ;;  %s170_s19 = scalar_lea.vmem %s103_s18, 256  ;;  %p175_p3 = scmp.lt.s32.totalorder %s103_s18, %s103_s18 }
  0x29   :  { %v52_v5 = vsel %vm51_vm0, %v47_v3, 0.0  ;;  %p171_p2 = scmp.ne.s32.totalorder %s103_s18, %s170_s19  ;;  %p176_p4 = scmp.lt.s32.totalorder %s170_s19, %s170_s19 }
  0x2a   :  { %53 = vadd.xlane.f32.xlu0 %v52_v5  ;;  %v55_v6 = vsel %vm51_vm0, %v48_v4, 0.0 }
  0x2b   :  { %p177_p5 = por %p176_p4, %p175_p3 }
  0x2d   :  { %p178_p6 = pnand %p177_p5, %p171_p2 }
  0x2e   :  { %56 = vadd.xlane.f32.xlu0 %v55_v6 }
  0xb7   :  { %v54_v7 = vpop.xlane.xlu0 %53 }
  0xb8   :  { %v59_v8 = vmul.f32 0.03125, %v54_v7 }
  0xba   :  { %v61_v9 = vsub.f32 %v47_v3, %v59_v8 }
  0xbb   :  { %v57_v10 = vpop.xlane.xlu0 %56 }
  0xbc   :  { %v60_v11 = vmul.f32 0.03125, %v57_v10  ;;  %v63_v12 = vmul.f32 %v61_v9, %v61_v9 }
  0xbe   :  { %v62_v13 = vsub.f32 %v48_v4, %v60_v11  ;;  %v65_v14 = vsel %vm51_vm0, %v63_v12, 0.0 }
  0xbf   :  { %66 = vadd.xlane.f32.xlu1 %v65_v14 }
  0xc0   :  { %v64_v15 = vmul.f32 %v62_v13, %v62_v13 }
  0xc2   :  { %v68_v16 = vsel %vm51_vm0, %v64_v15, 0.0 }
  0xc3   :  { %69 = vadd.xlane.f32.xlu1 %v68_v16 }
 0x14c   :  { %v67_v17 = vpop.xlane.xlu1 %66 }
 0x14d   :  { %v71_v18 = vmul.f32 0.03125, %v67_v17 }
 0x14f   :  { %v73_v19 = vadd.f32 1e-12, %v71_v18 }
 0x150   :  { %v70_v20 = vpop.xlane.xlu1 %69 }
 0x151   :  { %122 = vrsqrt.f32 %v73_v19  ;;  %v72_v21 = vmul.f32 0.03125, %v70_v20 }
 0x153   :  { %v74_v22 = vadd.f32 1e-12, %v72_v21 }
 0x155   :  { %124 = vrsqrt.f32 %v74_v22 }
 0x15b   :  { %v123_v23 = vpop.eup %122 }
 0x15c   :  { %v77_v25 = vmul.f32 %v123_v23, %v61_v9 }
 0x15e   :  { %v85_v27 = vmul.f32 %v115_v24, %v77_v25 }
 0x15f   :  { %v125_v28 = vpop.eup %124 }
 0x160   :  { %v78_v29 = vmul.f32 %v125_v28, %v62_v13  ;;  %v93_v30 = vadd.f32 %v116_v26, %v85_v27 }
 0x162   :  { %v86_v31 = vmul.f32 %v115_v24, %v78_v29  ;;  %95 = vst.msk [vmem:[#allocation7] sm:$0xff] %vm51_vm0, %v93_v30 }
 0x164   :  { %v94_v32 = vadd.f32 %v116_v26, %v86_v31 }
 0x166   :  { %96 = vst.msk [vmem:[#allocation7 + $0x8] sm:$0xff] %vm51_vm0, %v94_v32 }
 0x167   :  { %181 = shalt.err (!%p178_p6)
}
 0x168   :  { %s182_s20 = scalar_lea.hbm %s286_s4, 256 }
 0x169   :  { %p183_p7 = scmp.ne.s32.totalorder %s286_s4, %s182_s20  ;;  %p186_p8 = scmp.lt.u32.totalorder %s182_s20, %s286_s4 }
 0x16b   :  { %p188_p9 = pnand %p186_p8, %p183_p7 }
 0x16d   :  { %191 = shalt.err (!%p188_p9)
}
 0x16e   :  { %108 = dma.vmem_to_hbm [thread:$0]  %s103_s18, 256, %s286_s4, [#allocation4], %s199_s25, %s199_s25, %s200_s26  }
 0x16f   :  { %196 = dma.done.wait [#allocation4], 256  }
 0x170   :  { %197 = vsyncadd [#allocation4], 4294967040 }
 0x171   :  { %112 = vsyncpa [#allocation3], 1 }
 0x172   :  { %113 = vsyncpa [#allocation6], 1 }
 0x173   :  { %114 = vsyncpa [#allocation4], 1 }

</bundles_post_ra>
